<compile_context>
chip_gen: v5e
topology: v5e:2x2
jax: 0.10.0
libtpu: 0.0.40
codegen_flags: <defaults>
</compile_context>

<pallas_src>
from functools import partial

import jax
import jax.numpy as jnp
from jax import lax
from jax.experimental import pallas as pl
from jax.experimental.pallas import tpu as pltpu


def attention_kernel(x_ref, ln_g_ref, ln_b_ref, w_qkv_ref, w_out_ref, b_out_ref,
                     o_ref, head_acc_ref, *, heads, dim_head, scale, eps, q_tile):
    cdt = x_ref.dtype                          # MXU input dtype (e.g. bf16)
    bt, n, d = x_ref.shape                     # batch block, full sequence, embed
    inner = heads * dim_head

    qi = pl.program_id(1)
    q_start = pl.multiple_of(qi * q_tile, q_tile)

    gamma = ln_g_ref[...].astype(jnp.float32)  # (1, D)
    beta = ln_b_ref[...].astype(jnp.float32)   # (1, D)
    w_qkv = w_qkv_ref[...]                     # (D, 3*inner), native dtype

    def layer_norm(rows_f32):                  # PyTorch LayerNorm: biased var + eps
        mean = jnp.mean(rows_f32, axis=-1, keepdims=True)
        var = jnp.mean((rows_f32 - mean) ** 2, axis=-1, keepdims=True)
        return (rows_f32 - mean) * lax.rsqrt(var + eps) * gamma + beta

    # --- LayerNorm of every token in the batch block (K/V need all of them) ---
    x_ln = layer_norm(x_ref[...].reshape(bt * n, d).astype(jnp.float32)).astype(cdt)

    if q_tile == n:
        # Single query tile: one fused QKV matmul over the whole token slab.
        qkv = jnp.dot(x_ln, w_qkv, preferred_element_type=jnp.float32)   # (bt*n, 3*inner) f32
        # scale folded into q in f32, before the narrow-dtype cast
        q_all = (qkv[:, :inner] * scale).astype(cdt).reshape(bt, n, inner)
        k_all = qkv[:, inner:2 * inner].astype(cdt).reshape(bt, n, inner)
        v_all = qkv[:, 2 * inner:].astype(cdt).reshape(bt, n, inner)
    else:
        # Tiled queries: K/V over all tokens, Q only over this tile's rows.
        kv = jnp.dot(x_ln, w_qkv[:, inner:], preferred_element_type=jnp.float32)
        k_all = kv[:, :inner].astype(cdt).reshape(bt, n, inner)
        v_all = kv[:, inner:].astype(cdt).reshape(bt, n, inner)

        x_q = x_ref[:, pl.ds(q_start, q_tile), :].reshape(bt * q_tile, d)
        xq_ln = layer_norm(x_q.astype(jnp.float32)).astype(cdt)
        q_all = (jnp.dot(xq_ln, w_qkv[:, :inner], preferred_element_type=jnp.float32)
                 * scale).astype(cdt).reshape(bt, q_tile, inner)

    # --- attention per batch element / head; head outputs land in the scratch ---
    # Writing each head_out straight to the VMEM scratch bounds its live range:
    # only q/k/v slabs stay live across head iterations.
    for ib in range(bt):
        q_b = q_all[ib]                        # (q_tile, inner)
        k_b = k_all[ib]                        # (n, inner)
        v_b = v_all[ib]                        # (n, inner)
        rows = slice(ib * q_tile, (ib + 1) * q_tile)
        for h in range(heads):                 # static small unroll
            cols = slice(h * dim_head, (h + 1) * dim_head)
            q_h = q_b[:, cols]                 # (q_tile, dh), already scaled
            k_h = k_b[:, cols]                 # (n, dh)
            v_h = v_b[:, cols]                 # (n, dh)

            # QK^T without an explicit transpose: contract the dh axis of both.
            dots = lax.dot_general(q_h, k_h, (((1,), (1,)), ((), ())),
                                   preferred_element_type=jnp.float32)   # (q_tile, n) f32

            # Softmax in f32 (max-subtracted); denominator on the EUP.
            m = jnp.max(dots, axis=-1, keepdims=True)
            p = jnp.exp(dots - m)
            attn = p * pl.reciprocal(jnp.sum(p, axis=-1, keepdims=True), approx=True)

            head_out = jnp.dot(attn.astype(cdt), v_h,
                               preferred_element_type=jnp.float32)        # (q_tile, dh) f32
            head_acc_ref[rows, cols] = head_out.astype(cdt)

    # --- single output projection with full contraction depth K = inner ---
    y = jnp.dot(head_acc_ref[...], w_out_ref[...],
                preferred_element_type=jnp.float32)                       # (bt*q_tile, D) f32
    y = y + b_out_ref[...].astype(jnp.float32)
    o_ref[...] = y.reshape(o_ref.shape).astype(o_ref.dtype)


def attention(x, ln_g, ln_b, w_qkv, w_out, b_out, *, heads, dim_head, eps=1e-5,
              batch_block=None, q_tile=None):
    B, N, D = x.shape
    inner = heads * dim_head
    assert w_qkv.shape == (D, 3 * inner)
    assert w_out.shape == (inner, D)
    scale = dim_head ** (-0.5)
    bpe = jnp.dtype(x.dtype).itemsize

    # Batch blocking: amortize per-grid-step overhead, raise matmul M.
    if batch_block is None:
        batch_block = next(bt for bt in (4, 2, 1) if B % bt == 0)
    assert B % batch_block == 0

    # Query tiling: keeps both v7x TensorCores busy at small B and bounds the
    # (tq, N) softmax tiles for long sequences.  ViT-scale N fits in one tile.
    if q_tile is None:
        q_tile = N if N <= 512 else next((t for t in (256, 128, 64) if N % t == 0), N)
    assert N % q_tile == 0
    assert q_tile == N or q_tile % 8 == 0, "query tile must be sublane-aligned"

    grid = (B // batch_block, N // q_tile)

    kernel = partial(attention_kernel, heads=heads, dim_head=dim_head,
                     scale=scale, eps=eps, q_tile=q_tile)

    # Right-sized VMEM budget (double-buffered blocks + scratch + f32 intermediates).
    block_elems = (batch_block * N * D                 # x block
                   + batch_block * q_tile * D          # out block
                   + D * 3 * inner + inner * D + 3 * D)
    vmem_est = 2 * block_elems * bpe
    vmem_est += batch_block * q_tile * inner * bpe                      # head scratch
    vmem_est += batch_block * N * (3 * inner + D) * 4                   # f32 qkv + x_ln
    vmem_est += 2 * q_tile * N * 4                                      # dots + p (one head)
    vmem_est += batch_block * (N + q_tile) * inner * bpe                # q/k/v slabs
    vmem_limit = int(min(100 * 1024 * 1024, max(8 * 1024 * 1024, 2 * vmem_est)))

    flops = (2 * B * N * D * 3 * inner              # QKV projection
             + 4 * B * heads * N * N * dim_head     # QK^T + attn @ V
             + 2 * B * N * inner * D)               # output projection
    transcendentals = B * heads * N * N             # exp in softmax
    bytes_accessed = (2 * B * N * D * bpe
                      + (D * 3 * inner + inner * D + 3 * D) * bpe)
    cost = pl.CostEstimate(flops=flops, transcendentals=transcendentals,
                           bytes_accessed=bytes_accessed)

    return pl.pallas_call(
        kernel,
        out_shape=jax.ShapeDtypeStruct((B, N, D), x.dtype),
        grid=grid,
        in_specs=[
            pl.BlockSpec((batch_block, N, D), lambda b, qi: (b, 0, 0)),   # x (full seq)
            pl.BlockSpec((1, D), lambda b, qi: (0, 0)),                   # ln gamma
            pl.BlockSpec((1, D), lambda b, qi: (0, 0)),                   # ln beta
            pl.BlockSpec((D, 3 * inner), lambda b, qi: (0, 0)),           # W_qkv
            pl.BlockSpec((inner, D), lambda b, qi: (0, 0)),               # W_out
            pl.BlockSpec((1, D), lambda b, qi: (0, 0)),                   # b_out
        ],
        out_specs=pl.BlockSpec((batch_block, q_tile, D), lambda b, qi: (b, qi, 0)),
        scratch_shapes=[pltpu.VMEM((batch_block * q_tile, inner), x.dtype)],
        compiler_params=pltpu.CompilerParams(
            dimension_semantics=("parallel", "parallel"),
            vmem_limit_bytes=vmem_limit,
        ),
        cost_estimate=cost,
    )(x, ln_g.reshape(1, D), ln_b.reshape(1, D), w_qkv, w_out, b_out.reshape(1, D))


def attention_ref(x, ln_g, ln_b, w_qkv, w_out, b_out, *, heads, dim_head, eps=1e-5):
    # Pure-JAX f32 reference (mirrors the PyTorch forward) for correctness checking.
    B, N, D = x.shape
    inner = heads * dim_head
    scale = dim_head ** (-0.5)
    mean = jnp.mean(x, axis=-1, keepdims=True)
    var = jnp.mean((x - mean) ** 2, axis=-1, keepdims=True)
    x_ln = (x - mean) / jnp.sqrt(var + eps) * ln_g + ln_b
    qkv = x_ln @ w_qkv
    q, k, v = jnp.split(qkv, 3, axis=-1)

    def split_heads(t):
        return t.reshape(B, N, heads, dim_head).transpose(0, 2, 1, 3)

    q, k, v = map(split_heads, (q, k, v))
    dots = jnp.einsum("bhnd,bhmd->bhnm", q, k) * scale
    attn = jax.nn.softmax(dots, axis=-1)
    out = jnp.einsum("bhnm,bhmd->bhnd", attn, v)
    out = out.transpose(0, 2, 1, 3).reshape(B, N, inner)
    return out @ w_out + b_out


if __name__ == "__main__":
    def run_case(B, N, D, heads, dim_head, **kw):
        inner = heads * dim_head
        key = jax.random.PRNGKey(0)
        kx, kq, ko, kb, kg, kbe = jax.random.split(key, 6)
        # bf16 activations/weights exercise the intended MXU path (f32 accumulation).
        x = jax.random.normal(kx, (B, N, D), jnp.float32).astype(jnp.bfloat16)
        # PyTorch Linear stores (out, in) and does x @ W.T; here we directly
        # construct (in, out) matrices with equivalent math.
        w_qkv = (jax.random.normal(kq, (D, 3 * inner), jnp.float32) * 0.05).astype(jnp.bfloat16)
        w_out = (jax.random.normal(ko, (inner, D), jnp.float32) * 0.05).astype(jnp.bfloat16)
        b_out = (jax.random.normal(kb, (D,), jnp.float32) * 0.05).astype(jnp.bfloat16)
        ln_g = (1.0 + 0.1 * jax.random.normal(kg, (D,), jnp.float32)).astype(jnp.bfloat16)
        ln_b = (0.1 * jax.random.normal(kbe, (D,), jnp.float32)).astype(jnp.bfloat16)

        out = attention(x, ln_g, ln_b, w_qkv, w_out, b_out,
                        heads=heads, dim_head=dim_head, **kw)
        out = jax.block_until_ready(out)

        f32 = jnp.float32
        ref = attention_ref(x.astype(f32), ln_g.astype(f32), ln_b.astype(f32),
                            w_qkv.astype(f32), w_out.astype(f32), b_out.astype(f32),
                            heads=heads, dim_head=dim_head)
        assert out.shape == (B, N, D)
        assert jnp.allclose(out.astype(f32), ref, atol=5e-2, rtol=5e-2), \
            "mismatch vs f32 reference beyond bf16 tolerance"

    # Default path: batch block Bt=2, single query tile -> grid (1, 1).
    run_case(2, 8, 32, 4, 16)
    # Tiled path: query-tile grid axis exercised -> grid (1, 2).
    run_case(1, 16, 32, 4, 16, batch_block=1, q_tile=8)

    print("KERNEL_OK")
</pallas_src>

<mosaic_0001>
module attributes {stable_mosaic.version = 11 : i64} {
  func.func @attention_kernel(%arg0: i32, %arg1: i32, %arg2: memref<2x8x32xbf16, #tpu.memory_space<vmem>>, %arg3: memref<1x32xbf16, #tpu.memory_space<vmem>>, %arg4: memref<1x32xbf16, #tpu.memory_space<vmem>>, %arg5: memref<32x192xbf16, #tpu.memory_space<vmem>>, %arg6: memref<64x32xbf16, #tpu.memory_space<vmem>>, %arg7: memref<1x32xbf16, #tpu.memory_space<vmem>>, %arg8: memref<2x8x32xbf16, #tpu.memory_space<vmem>>, %arg9: memref<16x64xbf16, #tpu.memory_space<vmem>>) attributes {dimension_semantics = [#tpu.dimension_semantics<parallel>, #tpu.dimension_semantics<parallel>], iteration_bounds = array<i64: 1, 1>, scalar_prefetch = 0 : i64, scratch_operands = 1 : i64, tpu.core_type = #tpu.core_type<tc>, window_params = [{transform_indices = @transform_0, window_bounds = array<i64: 2, 8, 32>}, {pipeline_mode = #tpu.pipeline_mode<synchronous>, transform_indices = @transform_1, window_bounds = array<i64: 1, 32>}, {pipeline_mode = #tpu.pipeline_mode<synchronous>, transform_indices = @transform_2, window_bounds = array<i64: 1, 32>}, {pipeline_mode = #tpu.pipeline_mode<synchronous>, transform_indices = @transform_3, window_bounds = array<i64: 32, 192>}, {pipeline_mode = #tpu.pipeline_mode<synchronous>, transform_indices = @transform_4, window_bounds = array<i64: 64, 32>}, {pipeline_mode = #tpu.pipeline_mode<synchronous>, transform_indices = @transform_5, window_bounds = array<i64: 1, 32>}, {transform_indices = @transform_6, window_bounds = array<i64: 2, 8, 32>}]} {
    %c0 = arith.constant 0 : index
    %c0_0 = arith.constant 0 : index
    %0 = vector.load %arg3[%c0, %c0_0] : memref<1x32xbf16, #tpu.memory_space<vmem>>, vector<1x32xbf16>
    %1 = arith.extf %0 : vector<1x32xbf16> to vector<1x32xf32>
    %c0_1 = arith.constant 0 : index
    %c0_2 = arith.constant 0 : index
    %2 = vector.load %arg4[%c0_1, %c0_2] : memref<1x32xbf16, #tpu.memory_space<vmem>>, vector<1x32xbf16>
    %3 = arith.extf %2 : vector<1x32xbf16> to vector<1x32xf32>
    %c0_3 = arith.constant 0 : index
    %c0_4 = arith.constant 0 : index
    %4 = vector.load %arg5[%c0_3, %c0_4] : memref<32x192xbf16, #tpu.memory_space<vmem>>, vector<32x192xbf16>
    %c0_5 = arith.constant 0 : index
    %c0_6 = arith.constant 0 : index
    %c0_7 = arith.constant 0 : index
    %5 = vector.load %arg2[%c0_5, %c0_6, %c0_7] : memref<2x8x32xbf16, #tpu.memory_space<vmem>>, vector<2x8x32xbf16>
    %6 = vector.shape_cast %5 : vector<2x8x32xbf16> to vector<16x32xbf16>
    %7 = arith.extf %6 : vector<16x32xbf16> to vector<16x32xf32>
    %cst = arith.constant dense<0.000000e+00> : vector<16xf32>
    %8 = vector.multi_reduction <add>, %7, %cst [1] : vector<16x32xf32> to vector<16xf32>
    %9 = vector.shape_cast %8 : vector<16xf32> to vector<16x1xf32>
    %cst_8 = arith.constant 3.200000e+01 : f32
    %10 = vector.broadcast %cst_8 : f32 to vector<16x1xf32>
    %11 = arith.divf %9, %10 : vector<16x1xf32>
    %12 = vector.broadcast %11 : vector<16x1xf32> to vector<16x32xf32>
    %13 = arith.subf %7, %12 : vector<16x32xf32>
    %14 = arith.mulf %13, %13 : vector<16x32xf32>
    %cst_9 = arith.constant dense<0.000000e+00> : vector<16xf32>
    %15 = vector.multi_reduction <add>, %14, %cst_9 [1] : vector<16x32xf32> to vector<16xf32>
    %16 = vector.shape_cast %15 : vector<16xf32> to vector<16x1xf32>
    %cst_10 = arith.constant 3.200000e+01 : f32
    %17 = vector.broadcast %cst_10 : f32 to vector<16x1xf32>
    %18 = arith.divf %16, %17 : vector<16x1xf32>
    %19 = vector.broadcast %11 : vector<16x1xf32> to vector<16x32xf32>
    %20 = arith.subf %7, %19 : vector<16x32xf32>
    %cst_11 = arith.constant 9.99999974E-6 : f32
    %21 = vector.broadcast %cst_11 : f32 to vector<16x1xf32>
    %22 = arith.addf %18, %21 : vector<16x1xf32>
    %23 = math.rsqrt %22 : vector<16x1xf32>
    %24 = vector.broadcast %23 : vector<16x1xf32> to vector<16x32xf32>
    %25 = arith.mulf %20, %24 : vector<16x32xf32>
    %26 = vector.broadcast %1 : vector<1x32xf32> to vector<16x32xf32>
    %27 = arith.mulf %25, %26 : vector<16x32xf32>
    %28 = vector.broadcast %3 : vector<1x32xf32> to vector<16x32xf32>
    %29 = arith.addf %27, %28 : vector<16x32xf32>
    %30 = arith.truncf %29 : vector<16x32xf32> to vector<16x32xbf16>
    %cst_12 = arith.constant dense<0.000000e+00> : vector<16x192xf32>
    %31 = tpu.matmul %30, %4, %cst_12 {dimension_numbers = #tpu.dot_dimension_numbers<[1], [0], [0], [1], [0, 0, 1, 1], [], []>} : vector<16x32xbf16>, vector<32x192xbf16>, vector<16x192xf32> -> vector<16x192xf32>
    %32 = vector.extract_strided_slice %31 {offsets = [0, 0], sizes = [16, 64], strides = [1, 1]} : vector<16x192xf32> to vector<16x64xf32>
    %cst_13 = arith.constant 2.500000e-01 : f32
    %33 = vector.broadcast %cst_13 : f32 to vector<16x64xf32>
    %34 = arith.mulf %32, %33 : vector<16x64xf32>
    %35 = arith.truncf %34 : vector<16x64xf32> to vector<16x64xbf16>
    %36 = vector.shape_cast %35 : vector<16x64xbf16> to vector<2x8x64xbf16>
    %37 = vector.extract_strided_slice %31 {offsets = [0, 64], sizes = [16, 64], strides = [1, 1]} : vector<16x192xf32> to vector<16x64xf32>
    %38 = arith.truncf %37 : vector<16x64xf32> to vector<16x64xbf16>
    %39 = vector.shape_cast %38 : vector<16x64xbf16> to vector<2x8x64xbf16>
    %40 = vector.extract_strided_slice %31 {offsets = [0, 128], sizes = [16, 64], strides = [1, 1]} : vector<16x192xf32> to vector<16x64xf32>
    %41 = arith.truncf %40 : vector<16x64xf32> to vector<16x64xbf16>
    %42 = vector.shape_cast %41 : vector<16x64xbf16> to vector<2x8x64xbf16>
    %43 = vector.extract_strided_slice %36 {offsets = [0, 0, 0], sizes = [1, 8, 64], strides = [1, 1, 1]} : vector<2x8x64xbf16> to vector<1x8x64xbf16>
    %44 = vector.shape_cast %43 : vector<1x8x64xbf16> to vector<8x64xbf16>
    %45 = vector.extract_strided_slice %39 {offsets = [0, 0, 0], sizes = [1, 8, 64], strides = [1, 1, 1]} : vector<2x8x64xbf16> to vector<1x8x64xbf16>
    %46 = vector.shape_cast %45 : vector<1x8x64xbf16> to vector<8x64xbf16>
    %47 = vector.extract_strided_slice %42 {offsets = [0, 0, 0], sizes = [1, 8, 64], strides = [1, 1, 1]} : vector<2x8x64xbf16> to vector<1x8x64xbf16>
    %48 = vector.shape_cast %47 : vector<1x8x64xbf16> to vector<8x64xbf16>
    %49 = vector.extract_strided_slice %44 {offsets = [0, 0], sizes = [8, 16], strides = [1, 1]} : vector<8x64xbf16> to vector<8x16xbf16>
    %50 = vector.extract_strided_slice %46 {offsets = [0, 0], sizes = [8, 16], strides = [1, 1]} : vector<8x64xbf16> to vector<8x16xbf16>
    %51 = vector.extract_strided_slice %48 {offsets = [0, 0], sizes = [8, 16], strides = [1, 1]} : vector<8x64xbf16> to vector<8x16xbf16>
    %cst_14 = arith.constant dense<0.000000e+00> : vector<8x8xf32>
    %52 = tpu.matmul %49, %50, %cst_14 {dimension_numbers = #tpu.dot_dimension_numbers<[1], [1], [0], [0], [0, 0, 1, 0], [], []>} : vector<8x16xbf16>, vector<8x16xbf16>, vector<8x8xf32> -> vector<8x8xf32>
    %cst_15 = arith.constant dense<0xFF800000> : vector<8xf32>
    %53 = vector.multi_reduction <maximumf>, %52, %cst_15 [1] : vector<8x8xf32> to vector<8xf32>
    %54 = vector.shape_cast %53 : vector<8xf32> to vector<8x1xf32>
    %55 = vector.broadcast %54 : vector<8x1xf32> to vector<8x8xf32>
    %56 = arith.subf %52, %55 : vector<8x8xf32>
    %57 = math.exp %56 : vector<8x8xf32>
    %cst_16 = arith.constant dense<0.000000e+00> : vector<8xf32>
    %58 = vector.multi_reduction <add>, %57, %cst_16 [1] : vector<8x8xf32> to vector<8xf32>
    %59 = vector.shape_cast %58 : vector<8xf32> to vector<8x1xf32>
    %60 = tpu.reciprocal %59 {approx = true} : vector<8x1xf32> -> vector<8x1xf32>
    %61 = vector.broadcast %60 : vector<8x1xf32> to vector<8x8xf32>
    %62 = arith.mulf %57, %61 : vector<8x8xf32>
    %63 = arith.truncf %62 : vector<8x8xf32> to vector<8x8xbf16>
    %cst_17 = arith.constant dense<0.000000e+00> : vector<8x16xf32>
    %64 = tpu.matmul %63, %51, %cst_17 {dimension_numbers = #tpu.dot_dimension_numbers<[1], [0], [0], [1], [0, 0, 1, 1], [], []>} : vector<8x8xbf16>, vector<8x16xbf16>, vector<8x16xf32> -> vector<8x16xf32>
    %65 = arith.truncf %64 : vector<8x16xf32> to vector<8x16xbf16>
    %c0_18 = arith.constant 0 : index
    %c0_19 = arith.constant 0 : index
    %66 = vector.load %arg9[%c0_18, %c0_19] : memref<16x64xbf16, #tpu.memory_space<vmem>>, vector<8x16xbf16>
    tpu.vector_store %arg9[%c0_18, %c0_19], %65 {strides = array<i32>} : memref<16x64xbf16, #tpu.memory_space<vmem>>, vector<8x16xbf16>,
    %67 = vector.extract_strided_slice %44 {offsets = [0, 16], sizes = [8, 16], strides = [1, 1]} : vector<8x64xbf16> to vector<8x16xbf16>
    %68 = vector.extract_strided_slice %46 {offsets = [0, 16], sizes = [8, 16], strides = [1, 1]} : vector<8x64xbf16> to vector<8x16xbf16>
    %69 = vector.extract_strided_slice %48 {offsets = [0, 16], sizes = [8, 16], strides = [1, 1]} : vector<8x64xbf16> to vector<8x16xbf16>
    %cst_20 = arith.constant dense<0.000000e+00> : vector<8x8xf32>
    %70 = tpu.matmul %67, %68, %cst_20 {dimension_numbers = #tpu.dot_dimension_numbers<[1], [1], [0], [0], [0, 0, 1, 0], [], []>} : vector<8x16xbf16>, vector<8x16xbf16>, vector<8x8xf32> -> vector<8x8xf32>
    %cst_21 = arith.constant dense<0xFF800000> : vector<8xf32>
    %71 = vector.multi_reduction <maximumf>, %70, %cst_21 [1] : vector<8x8xf32> to vector<8xf32>
    %72 = vector.shape_cast %71 : vector<8xf32> to vector<8x1xf32>
    %73 = vector.broadcast %72 : vector<8x1xf32> to vector<8x8xf32>
    %74 = arith.subf %70, %73 : vector<8x8xf32>
    %75 = math.exp %74 : vector<8x8xf32>
    %cst_22 = arith.constant dense<0.000000e+00> : vector<8xf32>
    %76 = vector.multi_reduction <add>, %75, %cst_22 [1] : vector<8x8xf32> to vector<8xf32>
    %77 = vector.shape_cast %76 : vector<8xf32> to vector<8x1xf32>
    %78 = tpu.reciprocal %77 {approx = true} : vector<8x1xf32> -> vector<8x1xf32>
    %79 = vector.broadcast %78 : vector<8x1xf32> to vector<8x8xf32>
    %80 = arith.mulf %75, %79 : vector<8x8xf32>
    %81 = arith.truncf %80 : vector<8x8xf32> to vector<8x8xbf16>
    %cst_23 = arith.constant dense<0.000000e+00> : vector<8x16xf32>
    %82 = tpu.matmul %81, %69, %cst_23 {dimension_numbers = #tpu.dot_dimension_numbers<[1], [0], [0], [1], [0, 0, 1, 1], [], []>} : vector<8x8xbf16>, vector<8x16xbf16>, vector<8x16xf32> -> vector<8x16xf32>
    %83 = arith.truncf %82 : vector<8x16xf32> to vector<8x16xbf16>
    %c0_24 = arith.constant 0 : index
    %c16 = arith.constant 16 : index
    %84 = vector.load %arg9[%c0_24, %c16] : memref<16x64xbf16, #tpu.memory_space<vmem>>, vector<8x16xbf16>
    tpu.vector_store %arg9[%c0_24, %c16], %83 {strides = array<i32>} : memref<16x64xbf16, #tpu.memory_space<vmem>>, vector<8x16xbf16>,
    %85 = vector.extract_strided_slice %44 {offsets = [0, 32], sizes = [8, 16], strides = [1, 1]} : vector<8x64xbf16> to vector<8x16xbf16>
    %86 = vector.extract_strided_slice %46 {offsets = [0, 32], sizes = [8, 16], strides = [1, 1]} : vector<8x64xbf16> to vector<8x16xbf16>
    %87 = vector.extract_strided_slice %48 {offsets = [0, 32], sizes = [8, 16], strides = [1, 1]} : vector<8x64xbf16> to vector<8x16xbf16>
    %cst_25 = arith.constant dense<0.000000e+00> : vector<8x8xf32>
    %88 = tpu.matmul %85, %86, %cst_25 {dimension_numbers = #tpu.dot_dimension_numbers<[1], [1], [0], [0], [0, 0, 1, 0], [], []>} : vector<8x16xbf16>, vector<8x16xbf16>, vector<8x8xf32> -> vector<8x8xf32>
    %cst_26 = arith.constant dense<0xFF800000> : vector<8xf32>
    %89 = vector.multi_reduction <maximumf>, %88, %cst_26 [1] : vector<8x8xf32> to vector<8xf32>
    %90 = vector.shape_cast %89 : vector<8xf32> to vector<8x1xf32>
    %91 = vector.broadcast %90 : vector<8x1xf32> to vector<8x8xf32>
    %92 = arith.subf %88, %91 : vector<8x8xf32>
    %93 = math.exp %92 : vector<8x8xf32>
    %cst_27 = arith.constant dense<0.000000e+00> : vector<8xf32>
    %94 = vector.multi_reduction <add>, %93, %cst_27 [1] : vector<8x8xf32> to vector<8xf32>
    %95 = vector.shape_cast %94 : vector<8xf32> to vector<8x1xf32>
    %96 = tpu.reciprocal %95 {approx = true} : vector<8x1xf32> -> vector<8x1xf32>
    %97 = vector.broadcast %96 : vector<8x1xf32> to vector<8x8xf32>
    %98 = arith.mulf %93, %97 : vector<8x8xf32>
    %99 = arith.truncf %98 : vector<8x8xf32> to vector<8x8xbf16>
    %cst_28 = arith.constant dense<0.000000e+00> : vector<8x16xf32>
    %100 = tpu.matmul %99, %87, %cst_28 {dimension_numbers = #tpu.dot_dimension_numbers<[1], [0], [0], [1], [0, 0, 1, 1], [], []>} : vector<8x8xbf16>, vector<8x16xbf16>, vector<8x16xf32> -> vector<8x16xf32>
    %101 = arith.truncf %100 : vector<8x16xf32> to vector<8x16xbf16>
    %c0_29 = arith.constant 0 : index
    %c32 = arith.constant 32 : index
    %102 = vector.load %arg9[%c0_29, %c32] : memref<16x64xbf16, #tpu.memory_space<vmem>>, vector<8x16xbf16>
    tpu.vector_store %arg9[%c0_29, %c32], %101 {strides = array<i32>} : memref<16x64xbf16, #tpu.memory_space<vmem>>, vector<8x16xbf16>,
    %103 = vector.extract_strided_slice %44 {offsets = [0, 48], sizes = [8, 16], strides = [1, 1]} : vector<8x64xbf16> to vector<8x16xbf16>
    %104 = vector.extract_strided_slice %46 {offsets = [0, 48], sizes = [8, 16], strides = [1, 1]} : vector<8x64xbf16> to vector<8x16xbf16>
    %105 = vector.extract_strided_slice %48 {offsets = [0, 48], sizes = [8, 16], strides = [1, 1]} : vector<8x64xbf16> to vector<8x16xbf16>
    %cst_30 = arith.constant dense<0.000000e+00> : vector<8x8xf32>
    %106 = tpu.matmul %103, %104, %cst_30 {dimension_numbers = #tpu.dot_dimension_numbers<[1], [1], [0], [0], [0, 0, 1, 0], [], []>} : vector<8x16xbf16>, vector<8x16xbf16>, vector<8x8xf32> -> vector<8x8xf32>
    %cst_31 = arith.constant dense<0xFF800000> : vector<8xf32>
    %107 = vector.multi_reduction <maximumf>, %106, %cst_31 [1] : vector<8x8xf32> to vector<8xf32>
    %108 = vector.shape_cast %107 : vector<8xf32> to vector<8x1xf32>
    %109 = vector.broadcast %108 : vector<8x1xf32> to vector<8x8xf32>
    %110 = arith.subf %106, %109 : vector<8x8xf32>
    %111 = math.exp %110 : vector<8x8xf32>
    %cst_32 = arith.constant dense<0.000000e+00> : vector<8xf32>
    %112 = vector.multi_reduction <add>, %111, %cst_32 [1] : vector<8x8xf32> to vector<8xf32>
    %113 = vector.shape_cast %112 : vector<8xf32> to vector<8x1xf32>
    %114 = tpu.reciprocal %113 {approx = true} : vector<8x1xf32> -> vector<8x1xf32>
    %115 = vector.broadcast %114 : vector<8x1xf32> to vector<8x8xf32>
    %116 = arith.mulf %111, %115 : vector<8x8xf32>
    %117 = arith.truncf %116 : vector<8x8xf32> to vector<8x8xbf16>
    %cst_33 = arith.constant dense<0.000000e+00> : vector<8x16xf32>
    %118 = tpu.matmul %117, %105, %cst_33 {dimension_numbers = #tpu.dot_dimension_numbers<[1], [0], [0], [1], [0, 0, 1, 1], [], []>} : vector<8x8xbf16>, vector<8x16xbf16>, vector<8x16xf32> -> vector<8x16xf32>
    %119 = arith.truncf %118 : vector<8x16xf32> to vector<8x16xbf16>
    %c0_34 = arith.constant 0 : index
    %c48 = arith.constant 48 : index
    %120 = vector.load %arg9[%c0_34, %c48] : memref<16x64xbf16, #tpu.memory_space<vmem>>, vector<8x16xbf16>
    tpu.vector_store %arg9[%c0_34, %c48], %119 {strides = array<i32>} : memref<16x64xbf16, #tpu.memory_space<vmem>>, vector<8x16xbf16>,
    %121 = vector.extract_strided_slice %36 {offsets = [1, 0, 0], sizes = [1, 8, 64], strides = [1, 1, 1]} : vector<2x8x64xbf16> to vector<1x8x64xbf16>
    %122 = vector.shape_cast %121 : vector<1x8x64xbf16> to vector<8x64xbf16>
    %123 = vector.extract_strided_slice %39 {offsets = [1, 0, 0], sizes = [1, 8, 64], strides = [1, 1, 1]} : vector<2x8x64xbf16> to vector<1x8x64xbf16>
    %124 = vector.shape_cast %123 : vector<1x8x64xbf16> to vector<8x64xbf16>
    %125 = vector.extract_strided_slice %42 {offsets = [1, 0, 0], sizes = [1, 8, 64], strides = [1, 1, 1]} : vector<2x8x64xbf16> to vector<1x8x64xbf16>
    %126 = vector.shape_cast %125 : vector<1x8x64xbf16> to vector<8x64xbf16>
    %127 = vector.extract_strided_slice %122 {offsets = [0, 0], sizes = [8, 16], strides = [1, 1]} : vector<8x64xbf16> to vector<8x16xbf16>
    %128 = vector.extract_strided_slice %124 {offsets = [0, 0], sizes = [8, 16], strides = [1, 1]} : vector<8x64xbf16> to vector<8x16xbf16>
    %129 = vector.extract_strided_slice %126 {offsets = [0, 0], sizes = [8, 16], strides = [1, 1]} : vector<8x64xbf16> to vector<8x16xbf16>
    %cst_35 = arith.constant dense<0.000000e+00> : vector<8x8xf32>
    %130 = tpu.matmul %127, %128, %cst_35 {dimension_numbers = #tpu.dot_dimension_numbers<[1], [1], [0], [0], [0, 0, 1, 0], [], []>} : vector<8x16xbf16>, vector<8x16xbf16>, vector<8x8xf32> -> vector<8x8xf32>
    %cst_36 = arith.constant dense<0xFF800000> : vector<8xf32>
    %131 = vector.multi_reduction <maximumf>, %130, %cst_36 [1] : vector<8x8xf32> to vector<8xf32>
    %132 = vector.shape_cast %131 : vector<8xf32> to vector<8x1xf32>
    %133 = vector.broadcast %132 : vector<8x1xf32> to vector<8x8xf32>
    %134 = arith.subf %130, %133 : vector<8x8xf32>
    %135 = math.exp %134 : vector<8x8xf32>
    %cst_37 = arith.constant dense<0.000000e+00> : vector<8xf32>
    %136 = vector.multi_reduction <add>, %135, %cst_37 [1] : vector<8x8xf32> to vector<8xf32>
    %137 = vector.shape_cast %136 : vector<8xf32> to vector<8x1xf32>
    %138 = tpu.reciprocal %137 {approx = true} : vector<8x1xf32> -> vector<8x1xf32>
    %139 = vector.broadcast %138 : vector<8x1xf32> to vector<8x8xf32>
    %140 = arith.mulf %135, %139 : vector<8x8xf32>
    %141 = arith.truncf %140 : vector<8x8xf32> to vector<8x8xbf16>
    %cst_38 = arith.constant dense<0.000000e+00> : vector<8x16xf32>
    %142 = tpu.matmul %141, %129, %cst_38 {dimension_numbers = #tpu.dot_dimension_numbers<[1], [0], [0], [1], [0, 0, 1, 1], [], []>} : vector<8x8xbf16>, vector<8x16xbf16>, vector<8x16xf32> -> vector<8x16xf32>
    %143 = arith.truncf %142 : vector<8x16xf32> to vector<8x16xbf16>
    %c8 = arith.constant 8 : index
    %c0_39 = arith.constant 0 : index
    %144 = vector.load %arg9[%c8, %c0_39] : memref<16x64xbf16, #tpu.memory_space<vmem>>, vector<8x16xbf16>
    tpu.vector_store %arg9[%c8, %c0_39], %143 {strides = array<i32>} : memref<16x64xbf16, #tpu.memory_space<vmem>>, vector<8x16xbf16>,
    %145 = vector.extract_strided_slice %122 {offsets = [0, 16], sizes = [8, 16], strides = [1, 1]} : vector<8x64xbf16> to vector<8x16xbf16>
    %146 = vector.extract_strided_slice %124 {offsets = [0, 16], sizes = [8, 16], strides = [1, 1]} : vector<8x64xbf16> to vector<8x16xbf16>
    %147 = vector.extract_strided_slice %126 {offsets = [0, 16], sizes = [8, 16], strides = [1, 1]} : vector<8x64xbf16> to vector<8x16xbf16>
    %cst_40 = arith.constant dense<0.000000e+00> : vector<8x8xf32>
    %148 = tpu.matmul %145, %146, %cst_40 {dimension_numbers = #tpu.dot_dimension_numbers<[1], [1], [0], [0], [0, 0, 1, 0], [], []>} : vector<8x16xbf16>, vector<8x16xbf16>, vector<8x8xf32> -> vector<8x8xf32>
    %cst_41 = arith.constant dense<0xFF800000> : vector<8xf32>
    %149 = vector.multi_reduction <maximumf>, %148, %cst_41 [1] : vector<8x8xf32> to vector<8xf32>
    %150 = vector.shape_cast %149 : vector<8xf32> to vector<8x1xf32>
    %151 = vector.broadcast %150 : vector<8x1xf32> to vector<8x8xf32>
    %152 = arith.subf %148, %151 : vector<8x8xf32>
    %153 = math.exp %152 : vector<8x8xf32>
    %cst_42 = arith.constant dense<0.000000e+00> : vector<8xf32>
    %154 = vector.multi_reduction <add>, %153, %cst_42 [1] : vector<8x8xf32> to vector<8xf32>
    %155 = vector.shape_cast %154 : vector<8xf32> to vector<8x1xf32>
    %156 = tpu.reciprocal %155 {approx = true} : vector<8x1xf32> -> vector<8x1xf32>
    %157 = vector.broadcast %156 : vector<8x1xf32> to vector<8x8xf32>
    %158 = arith.mulf %153, %157 : vector<8x8xf32>
    %159 = arith.truncf %158 : vector<8x8xf32> to vector<8x8xbf16>
    %cst_43 = arith.constant dense<0.000000e+00> : vector<8x16xf32>
    %160 = tpu.matmul %159, %147, %cst_43 {dimension_numbers = #tpu.dot_dimension_numbers<[1], [0], [0], [1], [0, 0, 1, 1], [], []>} : vector<8x8xbf16>, vector<8x16xbf16>, vector<8x16xf32> -> vector<8x16xf32>
    %161 = arith.truncf %160 : vector<8x16xf32> to vector<8x16xbf16>
    %c8_44 = arith.constant 8 : index
    %c16_45 = arith.constant 16 : index
    %162 = vector.load %arg9[%c8_44, %c16_45] : memref<16x64xbf16, #tpu.memory_space<vmem>>, vector<8x16xbf16>
    tpu.vector_store %arg9[%c8_44, %c16_45], %161 {strides = array<i32>} : memref<16x64xbf16, #tpu.memory_space<vmem>>, vector<8x16xbf16>,
    %163 = vector.extract_strided_slice %122 {offsets = [0, 32], sizes = [8, 16], strides = [1, 1]} : vector<8x64xbf16> to vector<8x16xbf16>
    %164 = vector.extract_strided_slice %124 {offsets = [0, 32], sizes = [8, 16], strides = [1, 1]} : vector<8x64xbf16> to vector<8x16xbf16>
    %165 = vector.extract_strided_slice %126 {offsets = [0, 32], sizes = [8, 16], strides = [1, 1]} : vector<8x64xbf16> to vector<8x16xbf16>
    %cst_46 = arith.constant dense<0.000000e+00> : vector<8x8xf32>
    %166 = tpu.matmul %163, %164, %cst_46 {dimension_numbers = #tpu.dot_dimension_numbers<[1], [1], [0], [0], [0, 0, 1, 0], [], []>} : vector<8x16xbf16>, vector<8x16xbf16>, vector<8x8xf32> -> vector<8x8xf32>
    %cst_47 = arith.constant dense<0xFF800000> : vector<8xf32>
    %167 = vector.multi_reduction <maximumf>, %166, %cst_47 [1] : vector<8x8xf32> to vector<8xf32>
    %168 = vector.shape_cast %167 : vector<8xf32> to vector<8x1xf32>
    %169 = vector.broadcast %168 : vector<8x1xf32> to vector<8x8xf32>
    %170 = arith.subf %166, %169 : vector<8x8xf32>
    %171 = math.exp %170 : vector<8x8xf32>
    %cst_48 = arith.constant dense<0.000000e+00> : vector<8xf32>
    %172 = vector.multi_reduction <add>, %171, %cst_48 [1] : vector<8x8xf32> to vector<8xf32>
    %173 = vector.shape_cast %172 : vector<8xf32> to vector<8x1xf32>
    %174 = tpu.reciprocal %173 {approx = true} : vector<8x1xf32> -> vector<8x1xf32>
    %175 = vector.broadcast %174 : vector<8x1xf32> to vector<8x8xf32>
    %176 = arith.mulf %171, %175 : vector<8x8xf32>
    %177 = arith.truncf %176 : vector<8x8xf32> to vector<8x8xbf16>
    %cst_49 = arith.constant dense<0.000000e+00> : vector<8x16xf32>
    %178 = tpu.matmul %177, %165, %cst_49 {dimension_numbers = #tpu.dot_dimension_numbers<[1], [0], [0], [1], [0, 0, 1, 1], [], []>} : vector<8x8xbf16>, vector<8x16xbf16>, vector<8x16xf32> -> vector<8x16xf32>
    %179 = arith.truncf %178 : vector<8x16xf32> to vector<8x16xbf16>
    %c8_50 = arith.constant 8 : index
    %c32_51 = arith.constant 32 : index
    %180 = vector.load %arg9[%c8_50, %c32_51] : memref<16x64xbf16, #tpu.memory_space<vmem>>, vector<8x16xbf16>
    tpu.vector_store %arg9[%c8_50, %c32_51], %179 {strides = array<i32>} : memref<16x64xbf16, #tpu.memory_space<vmem>>, vector<8x16xbf16>,
    %181 = vector.extract_strided_slice %122 {offsets = [0, 48], sizes = [8, 16], strides = [1, 1]} : vector<8x64xbf16> to vector<8x16xbf16>
    %182 = vector.extract_strided_slice %124 {offsets = [0, 48], sizes = [8, 16], strides = [1, 1]} : vector<8x64xbf16> to vector<8x16xbf16>
    %183 = vector.extract_strided_slice %126 {offsets = [0, 48], sizes = [8, 16], strides = [1, 1]} : vector<8x64xbf16> to vector<8x16xbf16>
    %cst_52 = arith.constant dense<0.000000e+00> : vector<8x8xf32>
    %184 = tpu.matmul %181, %182, %cst_52 {dimension_numbers = #tpu.dot_dimension_numbers<[1], [1], [0], [0], [0, 0, 1, 0], [], []>} : vector<8x16xbf16>, vector<8x16xbf16>, vector<8x8xf32> -> vector<8x8xf32>
    %cst_53 = arith.constant dense<0xFF800000> : vector<8xf32>
    %185 = vector.multi_reduction <maximumf>, %184, %cst_53 [1] : vector<8x8xf32> to vector<8xf32>
    %186 = vector.shape_cast %185 : vector<8xf32> to vector<8x1xf32>
    %187 = vector.broadcast %186 : vector<8x1xf32> to vector<8x8xf32>
    %188 = arith.subf %184, %187 : vector<8x8xf32>
    %189 = math.exp %188 : vector<8x8xf32>
    %cst_54 = arith.constant dense<0.000000e+00> : vector<8xf32>
    %190 = vector.multi_reduction <add>, %189, %cst_54 [1] : vector<8x8xf32> to vector<8xf32>
    %191 = vector.shape_cast %190 : vector<8xf32> to vector<8x1xf32>
    %192 = tpu.reciprocal %191 {approx = true} : vector<8x1xf32> -> vector<8x1xf32>
    %193 = vector.broadcast %192 : vector<8x1xf32> to vector<8x8xf32>
    %194 = arith.mulf %189, %193 : vector<8x8xf32>
    %195 = arith.truncf %194 : vector<8x8xf32> to vector<8x8xbf16>
    %cst_55 = arith.constant dense<0.000000e+00> : vector<8x16xf32>
    %196 = tpu.matmul %195, %183, %cst_55 {dimension_numbers = #tpu.dot_dimension_numbers<[1], [0], [0], [1], [0, 0, 1, 1], [], []>} : vector<8x8xbf16>, vector<8x16xbf16>, vector<8x16xf32> -> vector<8x16xf32>
    %197 = arith.truncf %196 : vector<8x16xf32> to vector<8x16xbf16>
    %c8_56 = arith.constant 8 : index
    %c48_57 = arith.constant 48 : index
    %198 = vector.load %arg9[%c8_56, %c48_57] : memref<16x64xbf16, #tpu.memory_space<vmem>>, vector<8x16xbf16>
    tpu.vector_store %arg9[%c8_56, %c48_57], %197 {strides = array<i32>} : memref<16x64xbf16, #tpu.memory_space<vmem>>, vector<8x16xbf16>,
    %c0_58 = arith.constant 0 : index
    %c0_59 = arith.constant 0 : index
    %199 = vector.load %arg9[%c0_58, %c0_59] : memref<16x64xbf16, #tpu.memory_space<vmem>>, vector<16x64xbf16>
    %c0_60 = arith.constant 0 : index
    %c0_61 = arith.constant 0 : index
    %200 = vector.load %arg6[%c0_60, %c0_61] : memref<64x32xbf16, #tpu.memory_space<vmem>>, vector<64x32xbf16>
    %cst_62 = arith.constant dense<0.000000e+00> : vector<16x32xf32>
    %201 = tpu.matmul %199, %200, %cst_62 {dimension_numbers = #tpu.dot_dimension_numbers<[1], [0], [0], [1], [0, 0, 1, 1], [], []>} : vector<16x64xbf16>, vector<64x32xbf16>, vector<16x32xf32> -> vector<16x32xf32>
    %c0_63 = arith.constant 0 : index
    %c0_64 = arith.constant 0 : index
    %202 = vector.load %arg7[%c0_63, %c0_64] : memref<1x32xbf16, #tpu.memory_space<vmem>>, vector<1x32xbf16>
    %203 = arith.extf %202 : vector<1x32xbf16> to vector<1x32xf32>
    %204 = vector.broadcast %203 : vector<1x32xf32> to vector<16x32xf32>
    %205 = arith.addf %201, %204 : vector<16x32xf32>
    %206 = vector.shape_cast %205 : vector<16x32xf32> to vector<2x8x32xf32>
    %207 = arith.truncf %206 : vector<2x8x32xf32> to vector<2x8x32xbf16>
    %c0_65 = arith.constant 0 : index
    %c0_66 = arith.constant 0 : index
    %c0_67 = arith.constant 0 : index
    %208 = vector.load %arg8[%c0_65, %c0_66, %c0_67] : memref<2x8x32xbf16, #tpu.memory_space<vmem>>, vector<2x8x32xbf16>
    tpu.vector_store %arg8[%c0_65, %c0_66, %c0_67], %207 {strides = array<i32>} : memref<2x8x32xbf16, #tpu.memory_space<vmem>>, vector<2x8x32xbf16>,
    return
  }
  func.func @transform_0(%arg0: i32, %arg1: i32) -> (i32, i32, i32) {
    %c0_i32 = arith.constant 0 : i32
    %c0_i32_0 = arith.constant 0 : i32
    %c0_i32_1 = arith.constant 0 : i32
    return %arg0, %c0_i32, %c0_i32_0 : i32, i32, i32
  }
  func.func @transform_1(%arg0: i32, %arg1: i32) -> (i32, i32) {
    %c0_i32 = arith.constant 0 : i32
    %c0_i32_0 = arith.constant 0 : i32
    %c0_i32_1 = arith.constant 0 : i32
    return %c0_i32, %c0_i32_0 : i32, i32
  }
  func.func @transform_2(%arg0: i32, %arg1: i32) -> (i32, i32) {
    %c0_i32 = arith.constant 0 : i32
    %c0_i32_0 = arith.constant 0 : i32
    %c0_i32_1 = arith.constant 0 : i32
    return %c0_i32, %c0_i32_0 : i32, i32
  }
  func.func @transform_3(%arg0: i32, %arg1: i32) -> (i32, i32) {
    %c0_i32 = arith.constant 0 : i32
    %c0_i32_0 = arith.constant 0 : i32
    %c0_i32_1 = arith.constant 0 : i32
    return %c0_i32, %c0_i32_0 : i32, i32
  }
  func.func @transform_4(%arg0: i32, %arg1: i32) -> (i32, i32) {
    %c0_i32 = arith.constant 0 : i32
    %c0_i32_0 = arith.constant 0 : i32
    %c0_i32_1 = arith.constant 0 : i32
    return %c0_i32, %c0_i32_0 : i32, i32
  }
  func.func @transform_5(%arg0: i32, %arg1: i32) -> (i32, i32) {
    %c0_i32 = arith.constant 0 : i32
    %c0_i32_0 = arith.constant 0 : i32
    %c0_i32_1 = arith.constant 0 : i32
    return %c0_i32, %c0_i32_0 : i32, i32
  }
  func.func @transform_6(%arg0: i32, %arg1: i32) -> (i32, i32, i32) {
    %c0_i32 = arith.constant 0 : i32
    %c0_i32_0 = arith.constant 0 : i32
    return %arg0, %arg1, %c0_i32 : i32, i32, i32
  }
}

</mosaic_0001>

<bundles_post_ra>
// kernel: tpu_custom_call.1
= control target key start
LH: loop header
LB: loop body
LE: loop exit
PB: predicated region body
PF: predicated region fallthrough
CT: control target
= control target key end

     0   :  { %vm37_vm0 = vcmask 261120   ;;  %s1099_s0 = inlined_call_operand.vmem [shape: bf16[2,8,32], index: 0, kind: input, shape index: {}]   ;;  %s1100_s1 = inlined_call_operand.vmem [shape: bf16[1,32], index: 1, kind: input, shape index: {}]   ;;  %s1101_s2 = inlined_call_operand.vmem [shape: bf16[1,32], index: 2, kind: input, shape index: {}]   ;;  %s1102_s3 = inlined_call_operand.vmem [shape: bf16[32,192], index: 3, kind: input, shape index: {}]   ;;  %s1103_s4 = inlined_call_operand.vmem [shape: bf16[64,32], index: 4, kind: input, shape index: {}]   ;;  %s1104_s5 = inlined_call_operand.vmem [shape: bf16[1,32], index: 5, kind: input, shape index: {}]   ;;  %s1105_s6 = inlined_call_operand.hbm [shape: bf16[2,8,32], index: 6, kind: output, shape index: {}]  }
   0x1   :  { %v808_v0 = vld [vmem:[%s1099_s0] sm:$0xff]  }
   0x2   :  { %11 = vsyncpa [#allocation4], 0  ;;  %v809_v1 = vunpack.c.l.bf16 %v808_v0  ;;  %v810_v3 = vunpack.c.h.bf16 %v808_v0  ;;  %v885_v5 = vmov 32.0   ;;  %v753_v22 = vld [vmem:[%s1102_s3 + $0x10] sm:$0xf]  ;;  %vm196_vm8 = vcmask 1043456  }
   0x3   :  { %821 = vrcp.f32 %v885_v5  ;;  %v801_v23 = vld [vmem:[%s1102_s3 + $0x14] sm:$0xf0]  ;;  %v800_v24 = vld [vmem:[%s1102_s3 + $0x14] sm:$0xf]  ;;  %v755_v26 = vld [vmem:[%s1102_s3 + $0x18] sm:$0xf0] }
   0x4   :  { %v38_v2 = vsel %vm37_vm0, %v809_v1, 0.0  ;;  %v41_v4 = vsel %vm37_vm0, %v810_v3, 0.0  ;;  %v754_v25 = vor.u32 %v801_v23, %v753_v22  ;;  %v758_v27 = vor.u32 %v800_v24, %v755_v26  ;;  %v745_v28 = vld [vmem:[%s1102_s3] sm:$0xf]  ;;  %v799_v29 = vld [vmem:[%s1102_s3 + $0x4] sm:$0xf0] }
   0x5   :  { %39 = vadd.xlane.f32.xlu0 %v38_v2  ;;  %v798_v30 = vld [vmem:[%s1102_s3 + $0x4] sm:$0xf]  ;;  %v746_v32 = vor.u32 %v799_v29, %v745_v28  ;;  %v747_v33 = vld [vmem:[%s1102_s3 + $0x8] sm:$0xf0]  ;;  %v25_v48 = vld [vmem:[%s1100_s1] sm:$0x1] }
   0x6   :  { %125 = vmatpush.bf16.msra.mxu0 %v754_v25  ;;  %139 = vmatpush.bf16.msra.mxu1 %v758_v27  ;;  %v750_v35 = vor.u32 %v798_v30, %v747_v33  ;;  %v26_v50 = vunpack.c.l.bf16 %v25_v48  ;;  %v27_v53 = vld [vmem:[%s1101_s2] sm:$0x1]  ;;  %s886_s1 = smov 48   ;;  %s887_s2 = smov 64   ;;  %vm160_vm9 = vcmask 130048   ;;  %vm180_vm10 = vcmask 64512  }
   0x7   :  { %v28_v56 = vunpack.c.l.bf16 %v27_v53  ;;  %s888_s17 = smov 112   ;;  %s889_s18 = smov 32   ;;  %vm214_vm11 = vcmask 125952   ;;  %vm283_vm12 = vcmask 257152   ;;  %vm346_vm13 = vcmask 388352  }
   0x8   :  { %v89_v57 = vperm.slane %v26_v50, 0  ;;  %s890_s19 = smov 96   ;;  %s891_s20 = smov 80   ;;  %vm409_vm14 = vcmask 519552   ;;  %vm702_vm15 = vcmask 523264  }
   0x9   :  { %v822_v6 = vpop.eup %821  ;;  %v92_v62 = vperm.slane %v28_v56, 0  ;;  %s892_s21 = smov 16   ;;  %s731_s10 = sshll.u32 %s1105_s6, 4  ;;  %s732_s10 = int_to_ptr.hbm [resolvable:$true] %s731_s10 }
   0xa   :  { %v45_v7 = vmul.f32 32.0, %v822_v6  ;;  %vm49_vm1 = vweird.f32 %v822_v6  ;;  %126 = vmatpush.bf16.msra.mxu0 %v746_v32  ;;  %140 = vmatpush.bf16.msra.mxu1 %v750_v35 }
   0xc   :  { %v46_v8 = vsub.f32 1.0, %v45_v7 }
   0xd   :  { %42 = vadd.xlane.f32.xlu0 %v41_v4 }
   0xe   :  { %v47_v9 = vmul.f32 %v822_v6, %v46_v8 }
  0x10   :  { %v48_v10 = vadd.f32 %v822_v6, %v47_v9 }
  0x12   :  { %v50_v11 = vsel %vm49_vm1, %v822_v6, %v48_v10 }
  0x78   :  { %v40_v12 = vpop.xlane.xlu0 %39 }
  0x79   :  { %v51_v13 = vmul.f32 %v50_v11, %v40_v12 }
  0x7b   :  { %v53_v14 = vsub.f32 %v809_v1, %v51_v13 }
  0x7d   :  { %v55_v15 = vmul.f32 %v53_v14, %v53_v14 }
  0x7f   :  { %v57_v16 = vsel %vm37_vm0, %v55_v15, 0.0 }
  0x80   :  { %58 = vadd.xlane.f32.xlu1 %v57_v16  ;;  %v43_v17 = vpop.xlane.xlu0 %42 }
  0x81   :  { %v52_v18 = vmul.f32 %v50_v11, %v43_v17 }
  0x83   :  { %v54_v19 = vsub.f32 %v810_v3, %v52_v18 }
  0x85   :  { %v56_v20 = vmul.f32 %v54_v19, %v54_v19 }
  0x87   :  { %v60_v21 = vsel %vm37_vm0, %v56_v20, 0.0 }
  0x88   :  { %61 = vadd.xlane.f32.xlu1 %v60_v21 }
  0xf3   :  { %v59_v31 = vpop.xlane.xlu1 %58 }
  0xf4   :  { %v63_v34 = vmul.f32 %v59_v31, %v50_v11 }
  0xf6   :  { %v65_v36 = vadd.f32 1e-05, %v63_v34 }
  0xf8   :  { %823 = vrsqrt.f32 %v65_v36  ;;  %vm73_vm3 = vweird.f32 %v65_v36 }
  0xfb   :  { %v62_v37 = vpop.xlane.xlu1 %61 }
  0xfc   :  { %v64_v38 = vmul.f32 %v62_v37, %v50_v11 }
  0xfe   :  { %v824_v39 = vpop.eup %823  ;;  %v66_v40 = vadd.f32 1e-05, %v64_v38 }
  0xff   :  { %v68_v41 = vmul.f32 %v824_v39, %v65_v36  ;;  %vm74_vm2 = vweird.f32 %v824_v39 }
 0x100   :  { %825 = vrsqrt.f32 %v66_v40  ;;  %vm75_vm4 = vmor %vm73_vm3, %vm74_vm2  ;;  %vm83_vm6 = vweird.f32 %v66_v40 }
 0x101   :  { %v69_v42 = vmul.f32 %v824_v39, %v68_v41 }
 0x103   :  { %v70_v43 = vmul.f32 0.5, %v69_v42 }
 0x105   :  { %v71_v44 = vsub.f32 1.5, %v70_v43 }
 0x106   :  { %v826_v45 = vpop.eup %825 }
 0x107   :  { %v72_v46 = vmul.f32 %v824_v39, %v71_v44  ;;  %v78_v47 = vmul.f32 %v826_v45, %v66_v40  ;;  %vm84_vm5 = vweird.f32 %v826_v45 }
 0x108   :  { %vm85_vm7 = vmor %vm83_vm6, %vm84_vm5 }
 0x109   :  { %v79_v49 = vmul.f32 %v826_v45, %v78_v47  ;;  %v76_v51 = vsel %vm75_vm4, %v824_v39, %v72_v46 }
 0x10a   :  { %v87_v55 = vmul.f32 %v76_v51, %v53_v14 }
 0x10b   :  { %v80_v52 = vmul.f32 0.5, %v79_v49 }
 0x10c   :  { %v90_v61 = vmul.f32 %v89_v57, %v87_v55 }
 0x10d   :  { %v81_v54 = vsub.f32 1.5, %v80_v52 }
 0x10e   :  { %v93_v0 = vadd.f32 %v92_v62, %v90_v61 }
 0x10f   :  { %v82_v58 = vmul.f32 %v826_v45, %v81_v54 }
 0x111   :  { %v86_v59 = vsel %vm85_vm7, %v826_v45, %v82_v58 }
 0x112   :  { %v88_v60 = vmul.f32 %v86_v59, %v54_v19 }
 0x114   :  { %v91_v63 = vmul.f32 %v89_v57, %v88_v60 }
 0x116   :  { %v94_v1 = vadd.f32 %v92_v62, %v91_v63 }
 0x118   :  { %v95_v2 = vpack.c.bf16 %v94_v1, %v93_v0 }
 0x11a   :  { %759 = vmatmul.msk.bf16.vlgmr.msra.gmra.mxu0 %vm37_vm0, %v95_v2  ;;  %760 = vmatmul.msk.bf16.vlgmr.msra.gmra.mxu1 %vm37_vm0, %v95_v2  ;;  %vm722_vm0 = vcmask 257024  }
 0x197   :  { %v128_v3 = vpop.f32.mrf.mxu0  ;;  %v142_v4 = vpop.f32.mrf.mxu1 }
 0x198   :  { %v147_v5 = vmul.f32 0.25, %v128_v3  ;;  %v151_v6 = vpack.c.bf16 %v128_v3, %v128_v3  ;;  %v969_v7 = vpack.c.bf16 %v142_v4, %v142_v4 }
 0x19a   :  { %v149_v8 = vpack.c.bf16 %v147_v5, %v147_v5  ;;  %v156_v9 = vunpack.c.l.b16 %v151_v6  ;;  %v198_v10 = vsel %vm196_vm8, %v969_v7, 0 }
 0x19b   :  { %207 = vmatpush.bf16.msra.mxu3 %v198_v10 }
 0x19c   :  { %v157_v11 = vpack.c.b16 %v156_v9, %v156_v9  ;;  %v217_v12 = vunpack.c.l.b16 %v149_v8 }
 0x19e   :  { %221 = vrot.lane.b32.xlu1 %v157_v11, %s886_s1  ;;  %158 = vrot.lane.b32.xlu2 %v157_v11, %s887_s2  ;;  %v218_v13 = vpack.c.b16 %v217_v12, %v217_v12 }
 0x19f   :  { %v130_v14 = vpop.f32.mrf.mxu0  ;;  %v990_v32 = vpop.f32.mrf.mxu1 }
 0x1a0   :  { %219 = vrot.lane.b32.xlu0 %v218_v13, %s888_s17  ;;  %v152_v15 = vpack.c.bf16 %v130_v14, %v130_v14  ;;  %v148_v18 = vmul.f32 0.25, %v130_v14 }
 0x1a2   :  { %v412_v16 = vunpack.c.l.b16 %v152_v15  ;;  %v979_v19 = vpack.c.bf16 %v148_v18, %v148_v18 }
 0x1a4   :  { %v413_v17 = vpack.c.b16 %v412_v16, %v412_v16  ;;  %v469_v20 = vunpack.c.l.b16 %v979_v19 }
 0x1a6   :  { %287 = vrot.lane.b32.xlu1 %v157_v11, %s889_s18  ;;  %v470_v21 = vpack.c.b16 %v469_v20, %v469_v20 }
 0x1ae   :  { %285 = vrot.lane.b32.xlu1 %v218_v13, %s890_s19 }
 0x1b6   :  { %473 = vrot.lane.b32.xlu1 %v413_v17, %s886_s1 }
 0x1be   :  { %538 = vrot.lane.b32.xlu1 %v413_v17, %s889_s18 }
 0x1c6   :  { %536 = vrot.lane.b32.xlu1 %v470_v21, %s890_s19 }
 0x1f8   :  { %v159_v22 = vpop.permute.xlu2 %158 }
 0x1f9   :  { %v165_v23 = vsel %vm160_vm9, %v159_v22, 0 }
 0x1fa   :  { %174 = vmatpush.bf16.xpose.msra.mxu2 %v165_v23 }
 0x201   :  { %761 = vmatmul.msk.bf16.vlgmr.msra.gmra.mxu2 %vm160_vm9, %v149_v8 }
 0x210   :  { %v222_v24 = vpop.permute.xlu1 %221 }
 0x211   :  { %v227_v25 = vsel %vm160_vm9, %v222_v24, 0 }
 0x212   :  { %236 = vmatpush.bf16.xpose.msrb.mxu3 %v227_v25  ;;  %v220_v41 = vpop.permute.xlu0 %219 }
 0x218   :  { %v288_v26 = vpop.permute.xlu1 %287 }
 0x219   :  { %v293_v27 = vsel %vm160_vm9, %v288_v26, 0 }
 0x21a   :  { %302 = vmatpush.bf16.xpose.msrb.mxu1 %v293_v27 }
 0x220   :  { %v286_v28 = vpop.permute.xlu1 %285 }
 0x221   :  { %765 = vmatmul.msk.bf16.vlgmr.msrb.gmra.mxu1 %vm160_vm9, %v286_v28 }
 0x228   :  { %v474_v46 = vpop.permute.xlu1 %473 }
 0x229   :  { %v479_v51 = vsel %vm160_vm9, %v474_v46, 0 }
 0x230   :  { %v539_v49 = vpop.permute.xlu1 %538 }
 0x231   :  { %v544_v53 = vsel %vm160_vm9, %v539_v49, 0 }
 0x238   :  { %v537_v58 = vpop.permute.xlu1 %536 }
 0x284   :  { %v176_v29 = vpop.f32.mrf.mxu2 }
 0x285   :  { %v181_v30 = vsel %vm180_vm10, %v176_v29, -inf }
 0x286   :  { %182 = vmax.xlane.f32.xlu2 %v181_v30 }
 0x28c   :  { %v178_v31 = vpop.f32.mrf.mxu2 }
 0x29e   :  { %v304_v33 = vpop.f32.mrf.mxu1  ;;  %348 = vrot.lane.b32.xlu2 %v218_v13, %s891_s20 }
 0x29f   :  { %v308_v34 = vsel %vm180_vm10, %v304_v33, -inf }
 0x2a0   :  { %309 = vmax.xlane.f32.xlu1 %v308_v34 }
 0x2a6   :  { %v306_v35 = vpop.f32.mrf.mxu1  ;;  %598 = vrot.lane.b32.xlu2 %v470_v21, %s891_s20 }
 0x2f9   :  { %v183_v36 = vpop.xlane.xlu2 %182 }
 0x2fa   :  { %v184_v37 = vsub.f32 %v176_v29, %v183_v36 }
 0x2fc   :  { %v185_v38 = vmul.f32 1.442695, %v184_v37 }
 0x2fe   :  { %827 = vpow2.f32 %v185_v38 }
 0x301   :  { %v349_v55 = vpop.permute.xlu2 %348 }
 0x304   :  { %v828_v39 = vpop.eup %827 }
 0x305   :  { %v187_v40 = vsel %vm180_vm10, %v828_v39, 0.0 }
 0x306   :  { %188 = vadd.xlane.f32.xlu0 %v187_v40 }
 0x309   :  { %v599_v59 = vpop.permute.xlu2 %598 }
 0x313   :  { %v310_v62 = vpop.xlane.xlu1 %309 }
 0x314   :  { %v311_v0 = vsub.f32 %v304_v33, %v310_v62 }
 0x316   :  { %v312_v1 = vmul.f32 1.442695, %v311_v0 }
 0x31a   :  { %350 = vrot.lane.b32.xlu0 %v157_v11, %s892_s21 }
 0x322   :  { %414 = vrot.lane.b32.xlu0 %v413_v17, %s887_s2 }
 0x32a   :  { %471 = vrot.lane.b32.xlu0 %v470_v21, %s888_s17 }
 0x332   :  { %600 = vrot.lane.b32.xlu0 %v413_v17, %s892_s21 }
 0x379   :  { %v189_v42 = vpop.xlane.xlu0 %188 }
 0x37a   :  { %829 = vrcp.f32 %v189_v42 }
 0x37b   :  { %831 = vpow2.f32 %v312_v1 }
 0x380   :  { %v830_v43 = vpop.eup %829 }
 0x381   :  { %v191_v44 = vmul.f32 %v830_v43, %v828_v39  ;;  %v1015_v5 = vpop.eup %831 }
 0x382   :  { %v314_v9 = vsel %vm180_vm10, %v1015_v5, 0.0 }
 0x383   :  { %v192_v45 = vpack.c.bf16 %v191_v44, %v191_v44 }
 0x385   :  { %762 = vmatmul.msk.bf16.vlgmr.msra.gmra.mxu3 %vm180_vm10, %v192_v45 }
 0x38c   :  { %v351_v47 = vpop.permute.xlu0 %350 }
 0x38d   :  { %v356_v48 = vsel %vm160_vm9, %v351_v47, 0 }
 0x38e   :  { %365 = vmatpush.bf16.xpose.msra.mxu3 %v356_v48 }
 0x394   :  { %v415_v50 = vpop.permute.xlu0 %414 }
 0x395   :  { %v420_v52 = vsel %vm160_vm9, %v415_v50, 0  ;;  %763 = vmatmul.msk.bf16.vlgmr.msrb.gmra.mxu3 %vm160_vm9, %v220_v41 }
 0x396   :  { %488 = vmatpush.bf16.xpose.msrb.mxu3 %v479_v51  ;;  %429 = vmatpush.bf16.xpose.msra.mxu1 %v420_v52 }
 0x39c   :  { %v472_v54 = vpop.permute.xlu0 %471 }
 0x39d   :  { %769 = vmatmul.msk.bf16.vlgmr.msra.gmra.mxu1 %vm160_vm9, %v979_v19  ;;  %v255_v19 = vunpack.c.l.b16 %v969_v7 }
 0x39e   :  { %553 = vmatpush.bf16.xpose.msrb.mxu1 %v544_v53 }
 0x39f   :  { %v256_v21 = vpack.c.b16 %v255_v19, %v255_v19 }
 0x3a4   :  { %v601_v56 = vpop.permute.xlu0 %600 }
 0x3a5   :  { %v606_v57 = vsel %vm160_vm9, %v601_v56, 0  ;;  %767 = vmatmul.msk.bf16.vlgmr.msra.gmra.mxu3 %vm160_vm9, %v349_v55 }
 0x3a6   :  { %615 = vmatpush.bf16.xpose.msra.mxu3 %v606_v57 }
 0x3ad   :  { %773 = vmatmul.msk.bf16.vlgmr.msrb.gmra.mxu1 %vm160_vm9, %v537_v58 }
 0x3b5   :  { %771 = vmatmul.msk.bf16.vlgmr.msrb.gmra.mxu3 %vm160_vm9, %v472_v54  ;;  %v154_v54 = vpack.c.bf16 %v990_v32, %v990_v32 }
 0x3b7   :  { %v507_v55 = vunpack.c.l.b16 %v154_v54  ;;  %v451_v32 = vsel %vm196_vm8, %v154_v54, 0 }
 0x3b9   :  { %v508_v58 = vpack.c.b16 %v507_v55, %v507_v55 }
 0x3c5   :  { %775 = vmatmul.msk.bf16.vlgmr.msra.gmra.mxu3 %vm160_vm9, %v599_v59 }
 0x408   :  { %v209_v60 = vpop.f32.mrf.mxu3 }
 0x409   :  { %v213_v61 = vpack.c.bf16 %v209_v60, %v209_v60 }
 0x40b   :  { %215 = vst.msk [vmem:[#allocation2] sm:$0xf] %vm214_vm11, %v213_v61 }
 0x410   :  { %v211_v63 = vpop.f32.mrf.mxu3 }
 0x418   :  { %v238_v2 = vpop.f32.mrf.mxu3 }
 0x419   :  { %v242_v13 = vsel %vm180_vm10, %v238_v2, -inf }
 0x41a   :  { %v431_v3 = vpop.f32.mrf.mxu1 }
 0x41b   :  { %v435_v4 = vsel %vm180_vm10, %v431_v3, -inf }
 0x41c   :  { %436 = vmax.xlane.f32.xlu0 %v435_v4 }
 0x420   :  { %v240_v6 = vpop.f32.mrf.mxu3 }
 0x422   :  { %v433_v8 = vpop.f32.mrf.mxu1 }
 0x424   :  { %315 = vadd.xlane.f32.xlu0 %v314_v9 }
 0x428   :  { %v367_v10 = vpop.f32.mrf.mxu3 }
 0x429   :  { %v371_v11 = vsel %vm180_vm10, %v367_v10, -inf }
 0x42a   :  { %372 = vmax.xlane.f32.xlu2 %v371_v11  ;;  %v1020_v12 = vpop.f32.mrf.mxu1 }
 0x42b   :  { %v559_v14 = vsel %vm180_vm10, %v1020_v12, -inf }
 0x42c   :  { %243 = vmax.xlane.f32.xlu0 %v242_v13  ;;  %560 = vmax.xlane.f32.xlu1 %v559_v14 }
 0x430   :  { %v369_v15 = vpop.f32.mrf.mxu3 }
 0x432   :  { %v557_v16 = vpop.f32.mrf.mxu1 }
 0x438   :  { %v490_v17 = vpop.f32.mrf.mxu3 }
 0x439   :  { %v494_v18 = vsel %vm180_vm10, %v490_v17, -inf }
 0x43a   :  { %495 = vmax.xlane.f32.xlu2 %v494_v18 }
 0x440   :  { %v492_v20 = vpop.f32.mrf.mxu3 }
 0x445   :  { %257 = vrot.lane.b32.xlu1 %v256_v21, %s888_s17 }
 0x448   :  { %v617_v22 = vpop.f32.mrf.mxu3 }
 0x449   :  { %v621_v23 = vsel %vm180_vm10, %v617_v22, -inf }
 0x44a   :  { %622 = vmax.xlane.f32.xlu0 %v621_v23 }
 0x450   :  { %v619_v24 = vpop.f32.mrf.mxu3 }
 0x452   :  { %383 = vrot.lane.b32.xlu2 %v256_v21, %s891_s20 }
 0x45e   :  { %320 = vrot.lane.b32.xlu0 %v256_v21, %s890_s19 }
 0x48f   :  { %v437_v25 = vpop.xlane.xlu0 %436 }
 0x490   :  { %v438_v26 = vsub.f32 %v431_v3, %v437_v25 }
 0x492   :  { %v439_v27 = vmul.f32 1.442695, %v438_v26 }
 0x494   :  { %833 = vpow2.f32 %v439_v27 }
 0x497   :  { %v316_v28 = vpop.xlane.xlu0 %315 }
 0x49a   :  { %v1031_v29 = vpop.eup %833 }
 0x49b   :  { %v441_v7 = vsel %vm180_vm10, %v1031_v29, 0.0 }
 0x49c   :  { %442 = vadd.xlane.f32.xlu1 %v441_v7 }
 0x49d   :  { %v373_v30 = vpop.xlane.xlu2 %372 }
 0x49e   :  { %v374_v34 = vsub.f32 %v367_v10, %v373_v30 }
 0x49f   :  { %v244_v31 = vpop.xlane.xlu0 %243  ;;  %v561_v41 = vpop.xlane.xlu1 %560 }
 0x4a0   :  { %v245_v33 = vsub.f32 %v238_v2, %v244_v31  ;;  %v375_v36 = vmul.f32 1.442695, %v374_v34  ;;  %v562_v0 = vsub.f32 %v1020_v12, %v561_v41 }
 0x4a2   :  { %v246_v35 = vmul.f32 1.442695, %v245_v33  ;;  %v563_v1 = vmul.f32 1.442695, %v562_v0 }
 0x4a4   :  { %835 = vpow2.f32 %v246_v35 }
 0x4a5   :  { %837 = vpow2.f32 %v375_v36 }
 0x4aa   :  { %v836_v37 = vpop.eup %835 }
 0x4ab   :  { %v248_v38 = vsel %vm180_vm10, %v836_v37, 0.0  ;;  %v838_v42 = vpop.eup %837 }
 0x4ac   :  { %249 = vadd.xlane.f32.xlu2 %v248_v38  ;;  %v377_v44 = vsel %vm180_vm10, %v838_v42, 0.0 }
 0x4ad   :  { %v496_v39 = vpop.xlane.xlu2 %495 }
 0x4ae   :  { %v497_v40 = vsub.f32 %v490_v17, %v496_v39 }
 0x4b0   :  { %v498_v43 = vmul.f32 1.442695, %v497_v40 }
 0x4b2   :  { %839 = vpow2.f32 %v498_v43 }
 0x4b4   :  { %378 = vadd.xlane.f32.xlu2 %v377_v44 }
 0x4b5   :  { %v384_v45 = vpop.permute.xlu2 %383 }
 0x4b6   :  { %v389_v49 = vsel %vm196_vm8, %v384_v45, 0 }
 0x4b7   :  { %v258_v46 = vpop.permute.xlu1 %257 }
 0x4b8   :  { %v1037_v47 = vpop.eup %839  ;;  %v263_v48 = vsel %vm196_vm8, %v258_v46, 0 }
 0x4b9   :  { %272 = vmatpush.bf16.msrb.mxu0 %v263_v48  ;;  %v500_v50 = vsel %vm180_vm10, %v1037_v47, 0.0 }
 0x4ba   :  { %501 = vadd.xlane.f32.xlu0 %v500_v50 }
 0x4bd   :  { %398 = vmatpush.bf16.msra.mxu0 %v389_v49  ;;  %v623_v51 = vpop.xlane.xlu0 %622 }
 0x4be   :  { %v624_v52 = vsub.f32 %v617_v22, %v623_v51 }
 0x4c0   :  { %v625_v53 = vmul.f32 1.442695, %v624_v52 }
 0x4c2   :  { %841 = vpow2.f32 %v625_v53 }
 0x4c3   :  { %843 = vrcp.f32 %v316_v28 }
 0x4c4   :  { %845 = vpow2.f32 %v563_v1 }
 0x4c8   :  { %v842_v56 = vpop.eup %841 }
 0x4c9   :  { %v627_v57 = vsel %vm180_vm10, %v842_v56, 0.0  ;;  %v844_v59 = vpop.eup %843 }
 0x4ca   :  { %628 = vadd.xlane.f32.xlu1 %v627_v57  ;;  %v318_v60 = vmul.f32 %v844_v59, %v1015_v5  ;;  %v846_v2 = vpop.eup %845  ;;  %v806_v59 = vld [vmem:[%s1103_s4 + $0x18] sm:$0xff] }
 0x4cb   :  { %v565_v3 = vsel %vm180_vm10, %v846_v2, 0.0  ;;  %710 = vmatpush.bf16.msra.mxu1 %v806_v59 }
 0x4cc   :  { %509 = vrot.lane.b32.xlu2 %v508_v58, %s888_s17  ;;  %v319_v63 = vpack.c.bf16 %v318_v60, %v318_v60  ;;  %v805_v60 = vld [vmem:[%s1103_s4 + $0x10] sm:$0xff] }
 0x4ce   :  { %571 = vrot.lane.b32.xlu0 %v508_v58, %s890_s19 }
 0x4cf   :  { %711 = vmatpush.bf16.msra.mxu1 %v805_v60 }
 0x4d0   :  { %v321_v61 = vpop.permute.xlu0 %320 }
 0x4d1   :  { %v326_v62 = vsel %vm196_vm8, %v321_v61, 0  ;;  %v804_v61 = vld [vmem:[%s1103_s4 + $0x8] sm:$0xff] }
 0x4d2   :  { %335 = vmatpush.bf16.msrb.mxu2 %v326_v62  ;;  %v803_v62 = vld [vmem:[%s1103_s4] sm:$0xff]  ;;  %s893_s4 = smov [#allocation3]  }
 0x4d3   :  { %712 = vmatpush.bf16.msra.mxu1 %v804_v61  ;;  %s729_s7 = sshll.u32 %s893_s4, 4  ;;  %s730_s7 = int_to_ptr.vmem [resolvable:$true] %s729_s7 }
 0x4d5   :  { %766 = vmatmul.msk.bf16.vlgmr.msrb.gmra.mxu2 %vm180_vm10, %v319_v63 }
 0x4d6   :  { %460 = vmatpush.bf16.msra.mxu2 %v451_v32 }
 0x4d7   :  { %713 = vmatpush.bf16.msra.mxu1 %v803_v62 }
 0x4e3   :  { %633 = vrot.lane.b32.xlu1 %v508_v58, %s891_s20 }
 0x4f5   :  { %566 = vadd.xlane.f32.xlu2 %v565_v3 }
 0x50f   :  { %v443_v4 = vpop.xlane.xlu1 %442 }
 0x510   :  { %847 = vrcp.f32 %v443_v4 }
 0x516   :  { %v848_v5 = vpop.eup %847 }
 0x517   :  { %v445_v6 = vmul.f32 %v848_v5, %v1031_v29 }
 0x519   :  { %v446_v8 = vpack.c.bf16 %v445_v6, %v445_v6 }
 0x51b   :  { %770 = vmatmul.msk.bf16.vlgmr.msra.gmra.mxu2 %vm180_vm10, %v446_v8 }
 0x51f   :  { %v250_v9 = vpop.xlane.xlu2 %249 }
 0x520   :  { %849 = vrcp.f32 %v250_v9 }
 0x526   :  { %v850_v10 = vpop.eup %849 }
 0x527   :  { %v252_v11 = vmul.f32 %v850_v10, %v836_v37  ;;  %v379_v12 = vpop.xlane.xlu2 %378 }
 0x528   :  { %851 = vrcp.f32 %v379_v12 }
 0x529   :  { %v253_v13 = vpack.c.bf16 %v252_v11, %v252_v11 }
 0x52b   :  { %764 = vmatmul.msk.bf16.vlgmr.msrb.gmra.mxu0 %vm180_vm10, %v253_v13 }
 0x52d   :  { %v502_v18 = vpop.xlane.xlu0 %501 }
 0x52e   :  { %v852_v16 = vpop.eup %851  ;;  %853 = vrcp.f32 %v502_v18 }
 0x52f   :  { %v510_v14 = vpop.permute.xlu2 %509  ;;  %v381_v17 = vmul.f32 %v852_v16, %v838_v42 }
 0x530   :  { %v515_v15 = vsel %vm196_vm8, %v510_v14, 0 }
 0x531   :  { %524 = vmatpush.bf16.msrb.mxu0 %v515_v15  ;;  %v382_v19 = vpack.c.bf16 %v381_v17, %v381_v17 }
 0x534   :  { %v854_v22 = vpop.eup %853 }
 0x535   :  { %v504_v23 = vmul.f32 %v854_v22, %v1037_v47 }
 0x537   :  { %v505_v24 = vpack.c.bf16 %v504_v23, %v504_v23 }
 0x53b   :  { %768 = vmatmul.msk.bf16.vlgmr.msra.gmra.mxu0 %vm180_vm10, %v382_v19 }
 0x53d   :  { %v629_v25 = vpop.xlane.xlu1 %628 }
 0x53e   :  { %855 = vrcp.f32 %v629_v25 }
 0x540   :  { %v572_v20 = vpop.permute.xlu0 %571 }
 0x541   :  { %v577_v21 = vsel %vm196_vm8, %v572_v20, 0 }
 0x542   :  { %586 = vmatpush.bf16.msrb.mxu2 %v577_v21 }
 0x544   :  { %v856_v26 = vpop.eup %855 }
 0x545   :  { %v631_v27 = vmul.f32 %v856_v26, %v842_v56 }
 0x547   :  { %v632_v30 = vpack.c.bf16 %v631_v27, %v631_v27 }
 0x54b   :  { %772 = vmatmul.msk.bf16.vlgmr.msrb.gmra.mxu0 %vm180_vm10, %v505_v24 }
 0x555   :  { %v634_v28 = vpop.permute.xlu1 %633 }
 0x556   :  { %v639_v29 = vsel %vm196_vm8, %v634_v28, 0 }
 0x557   :  { %648 = vmatpush.bf16.msra.mxu0 %v639_v29 }
 0x558   :  { %v337_v7 = vpop.f32.mrf.mxu2 }
 0x559   :  { %v341_v31 = vpack.c.bf16 %v337_v7, %v337_v7 }
 0x55b   :  { %343 = vrot.lane.b32.xlu1 %v341_v31, %s889_s18  ;;  %776 = vmatmul.msk.bf16.vlgmr.msra.gmra.mxu0 %vm180_vm10, %v632_v30 }
 0x560   :  { %v339_v33 = vpop.f32.mrf.mxu2 }
 0x568   :  { %v567_v34 = vpop.xlane.xlu2 %566 }
 0x569   :  { %857 = vrcp.f32 %v567_v34 }
 0x56f   :  { %v858_v35 = vpop.eup %857 }
 0x570   :  { %v569_v36 = vmul.f32 %v858_v35, %v846_v2  ;;  %v670_v2 = vld [vmem:[%s1104_s5] sm:$0x1]  ;;  %s894_s5 = smov 4  }
 0x571   :  { %v671_v3 = vunpack.c.l.bf16 %v670_v2 }
 0x572   :  { %v570_v37 = vpack.c.bf16 %v569_v36, %v569_v36 }
 0x573   :  { %v672_v4 = vperm.slane %v671_v3, 0 }
 0x574   :  { %774 = vmatmul.msk.bf16.vlgmr.msrb.gmra.mxu2 %vm180_vm10, %v570_v37 }
 0x59e   :  { %v462_v38 = vpop.f32.mrf.mxu2 }
 0x59f   :  { %v466_v39 = vpack.c.bf16 %v462_v38, %v462_v38 }
 0x5a1   :  { %467 = vst.msk [vmem:[#allocation2 + $0x4] sm:$0xf] %vm214_vm11, %v466_v39 }
 0x5a6   :  { %v464_v40 = vpop.f32.mrf.mxu2 }
 0x5a8   :  { %v274_v41 = vpop.f32.mrf.mxu0 }
 0x5a9   :  { %v278_v42 = vpack.c.bf16 %v274_v41, %v274_v41 }
 0x5ab   :  { %280 = vrot.lane.b32.xlu2 %v278_v42, %s892_s21 }
 0x5b0   :  { %v276_v43 = vpop.f32.mrf.mxu0 }
 0x5b8   :  { %v400_v44 = vpop.f32.mrf.mxu0 }
 0x5b9   :  { %v404_v45 = vpack.c.bf16 %v400_v44, %v400_v44 }
 0x5bb   :  { %406 = vrot.lane.b32.xlu1 %v404_v45, %s886_s1 }
 0x5c0   :  { %v402_v46 = vpop.f32.mrf.mxu0 }
 0x5c8   :  { %v526_v47 = vpop.f32.mrf.mxu0 }
 0x5c9   :  { %v530_v54 = vpack.c.bf16 %v526_v47, %v526_v47 }
 0x5cd   :  { %v344_v56 = vpop.permute.xlu1 %343 }
 0x5d0   :  { %v528_v48 = vpop.f32.mrf.mxu0 }
 0x5d8   :  { %v650_v49 = vpop.f32.mrf.mxu0 }
 0x5d9   :  { %v654_v57 = vpack.c.bf16 %v650_v49, %v650_v49 }
 0x5e0   :  { %v652_v50 = vpop.f32.mrf.mxu0 }
 0x5f7   :  { %v588_v51 = vpop.f32.mrf.mxu2 }
 0x5f8   :  { %v592_v52 = vpack.c.bf16 %v588_v51, %v588_v51 }
 0x5fa   :  { %594 = vrot.lane.b32.xlu0 %v592_v52, %s889_s18 }
 0x5ff   :  { %v590_v53 = vpop.f32.mrf.mxu2 }
 0x602   :  { %532 = vrot.lane.b32.xlu0 %v530_v54, %s892_s21 }
 0x605   :  { %v281_v55 = vpop.permute.xlu2 %280 }
 0x606   :  { %284 = vst.msk [vmem:[#allocation2] sm:$0xf] %vm283_vm12, %v281_v55 }
 0x607   :  { %347 = vst.msk [vmem:[#allocation2] sm:$0xf] %vm346_vm13, %v344_v56 }
 0x60a   :  { %656 = vrot.lane.b32.xlu0 %v654_v57, %s886_s1 }
 0x62d   :  { %v407_v58 = vpop.permute.xlu1 %406 }
 0x62e   :  { %410 = vst.msk [vmem:[#allocation2] sm:$0xf] %vm409_vm14, %v407_v58 }
 0x66c   :  { %v595_v32 = vpop.permute.xlu0 %594 }
 0x674   :  { %v533_v63 = vpop.permute.xlu0 %532 }
 0x675   :  { %535 = vst.msk [vmem:[#allocation2 + $0x4] sm:$0xf] %vm283_vm12, %v533_v63 }
 0x676   :  { %597 = vst.msk [vmem:[#allocation2 + $0x4] sm:$0xf] %vm346_vm13, %v595_v32 }
 0x67c   :  { %v657_v0 = vpop.permute.xlu0 %656 }
 0x67d   :  { %659 = vst.msk [vmem:[#allocation2 + $0x4] sm:$0xf] %vm409_vm14, %v657_v0 }
 0x684   :  { %v802_v1 = vld [vmem:[#allocation2] sm:$0xff] }
 0x685   :  { %797 = vmatmul.msk.bf16.vlgmr.msra.gmra.mxu1 %vm702_vm15, %v802_v1 }
 0x702   :  { %v715_v5 = vpop.f32.mrf.mxu1 }
 0x703   :  { %v716_v6 = vadd.f32 %v715_v5, %v672_v4 }
 0x705   :  { %v720_v8 = vpack.c.bf16 %v716_v6, %v716_v6 }
 0x707   :  { %723 = vst.msk [vmem:[#allocation3] sm:$0xf] %vm722_vm0, %v720_v8 }
 0x70a   :  { %v717_v9 = vpop.f32.mrf.mxu1 }
 0x70b   :  { %v718_v10 = vadd.f32 %v717_v9, %v672_v4 }
 0x70d   :  { %v721_v11 = vpack.c.bf16 %v718_v10, %v718_v10 }
 0x70f   :  { %724 = vst.msk [vmem:[#allocation3 + $0x4] sm:$0xf] %vm722_vm0, %v721_v11 }
 0x710   :  { %737 = dma.vmem_to_hbm [thread:$0]  %s730_s7, 128, %s732_s10, [#allocation4], %s887_s2, %s887_s2, %s894_s5  }
 0x711   :  { %883 = dma.done.wait [#allocation4], 128  }
 0x712   :  { %884 = vsyncadd [#allocation4], 4294967168 }
 0x713   :  { %742 = vsyncpa [#allocation4], 1 }

</bundles_post_ra>
